<compile_context>
chip_gen: v6e
topology: v6e:2x2x1
jax: 0.10.0
libtpu: 0.0.40
codegen_flags: <defaults>
</compile_context>

<pallas_src>
import jax
import jax.numpy as jnp
from jax.experimental import pallas as pl
from jax.experimental.pallas import tpu as pltpu

K = 5      # Conv3d kernel_size
PAD = 2    # Conv3d padding


def _band(n: int) -> jnp.ndarray:
    """(n, n) float32 matrix with 1 where |i - j| <= PAD (box sum w/ zero pad)."""
    idx = jnp.arange(n)
    return (jnp.abs(idx[:, None] - idx[None, :]) <= PAD).astype(jnp.float32)


def dilation_kernel(bd_ref, bhw_ref, x_ref, o_ref):
    # bd_ref : (D, D)       depth band matrix, f32 (resident across grid steps)
    # bhw_ref: (HW, HW)     kron(band_H, band_W), f32 (resident across grid steps)
    # x_ref  : (1, D, HW)   one batch element, (H, W) flattened -> lane-dense
    # o_ref  : (1, D, HW)   output volume
    x = x_ref[0]
    if x.dtype != jnp.float32:          # single cast, no per-tap converts
        x = x.astype(jnp.float32)
    # Depth box sum: (D, D) @ (D, HW) on the MXU (zero padding encoded in band).
    s = jnp.dot(bd_ref[...], x, preferred_element_type=jnp.float32)
    # H and W box sums in one shot: (D, HW) @ (HW, HW) on the MXU.
    o = jnp.dot(s, bhw_ref[...], preferred_element_type=jnp.float32)
    o_ref[0] = o.astype(o_ref.dtype)


def dilation(x):
    """Equivalent of Dilation.forward(x) for x of shape (N, 1, D, H, W)."""
    N, C, D, H, W = x.shape
    assert C == 1, "Dilation module has a single input channel"
    HW = H * W

    # Metadata-only reshape (contiguous trailing dims) -> no extra HBM pass.
    x2 = x.reshape(N, D, HW)

    # Band matrices encode the kernel_size=5 / padding=2 box sum incl. borders.
    bd = _band(D)                                    # (D, D)
    bhw = jnp.kron(_band(H), _band(W))               # (HW, HW)

    # VMEM budget: resident bands + double-buffered in/out blocks + f32
    # intermediates, with headroom, clamped below every generation's VMEM.
    elem = jnp.dtype(x.dtype).itemsize
    block_bytes = ((bd.size + bhw.size) * 4          # resident band matrices
                   + 2 * 2 * D * HW * elem           # double-buffered in + out
                   + 4 * D * HW * 4)                 # f32 intermediates, slack
    vmem_limit = int(min(48 << 20, max(16 << 20, 4 * block_bytes)))

    out = pl.pallas_call(
        dilation_kernel,
        out_shape=jax.ShapeDtypeStruct((N, D, HW), x.dtype),
        grid_spec=pltpu.PrefetchScalarGridSpec(
            num_scalar_prefetch=0,
            grid=(N,),
            in_specs=[
                pl.BlockSpec((D, D), lambda n: (0, 0)),       # resident
                pl.BlockSpec((HW, HW), lambda n: (0, 0)),     # resident
                pl.BlockSpec((1, D, HW), lambda n: (n, 0, 0)),
            ],
            out_specs=pl.BlockSpec((1, D, HW), lambda n: (n, 0, 0)),
        ),
        compiler_params=pltpu.CompilerParams(
            dimension_semantics=("parallel",),   # megacore-shard the batch
            vmem_limit_bytes=vmem_limit,
        ),
    )(bd, bhw, x2)

    # Restore NCDHW (channel dim), same as PyTorch Conv3d output.
    return out.reshape(N, 1, D, H, W)


def _reference(x):
    """Pure-JAX reference: Conv3d(1,1,5,padding=2,bias=False), all-ones weight."""
    N, C, D, H, W = x.shape
    xp = jnp.pad(x[:, 0].astype(jnp.float32),
                 ((0, 0), (PAD, PAD), (PAD, PAD), (PAD, PAD)))
    acc = jnp.zeros((N, D, H, W), jnp.float32)
    for kd in range(K):
        for kh in range(K):
            for kw in range(K):
                acc = acc + xp[:, kd:kd + D, kh:kh + H, kw:kw + W]
    return acc[:, None].astype(x.dtype)


if __name__ == "__main__":
    key = jax.random.PRNGKey(0)
    # Small shapes consistent with a Conv3d(1, 1, 5, padding=2) forward.
    x = jax.random.normal(key, (2, 1, 8, 16, 16), dtype=jnp.float32)

    y = dilation(x)
    y = jax.block_until_ready(y)

    y_ref = _reference(x)
    assert y.shape == (2, 1, 8, 16, 16)
    assert jnp.allclose(y, y_ref, atol=1e-4, rtol=1e-4)

    print("KERNEL_OK")
</pallas_src>

<mosaic_0001>
module attributes {stable_mosaic.version = 11 : i64} {
  func.func @dilation_kernel(%arg0: i32, %arg1: memref<8x8xf32, #tpu.memory_space<vmem>>, %arg2: memref<256x256xf32, #tpu.memory_space<vmem>>, %arg3: memref<1x8x256xf32, #tpu.memory_space<vmem>>, %arg4: memref<1x8x256xf32, #tpu.memory_space<vmem>>) attributes {dimension_semantics = [#tpu.dimension_semantics<parallel>], iteration_bounds = array<i64: 2>, scalar_prefetch = 0 : i64, scratch_operands = 0 : i64, tpu.core_type = #tpu.core_type<tc>, window_params = [{pipeline_mode = #tpu.pipeline_mode<synchronous>, transform_indices = @transform_0, window_bounds = array<i64: 8, 8>}, {pipeline_mode = #tpu.pipeline_mode<synchronous>, transform_indices = @transform_1, window_bounds = array<i64: 256, 256>}, {transform_indices = @transform_2, window_bounds = array<i64: 1, 8, 256>}, {transform_indices = @transform_3, window_bounds = array<i64: 1, 8, 256>}]} {
    %c0 = arith.constant 0 : index
    %c0_0 = arith.constant 0 : index
    %c0_1 = arith.constant 0 : index
    %0 = vector.load %arg3[%c0, %c0_0, %c0_1] : memref<1x8x256xf32, #tpu.memory_space<vmem>>, vector<1x8x256xf32>
    %1 = vector.shape_cast %0 : vector<1x8x256xf32> to vector<8x256xf32>
    %c0_2 = arith.constant 0 : index
    %c0_3 = arith.constant 0 : index
    %2 = vector.load %arg1[%c0_2, %c0_3] : memref<8x8xf32, #tpu.memory_space<vmem>>, vector<8x8xf32>
    %cst = arith.constant dense<0.000000e+00> : vector<8x256xf32>
    %3 = tpu.matmul %2, %1, %cst {dimension_numbers = #tpu.dot_dimension_numbers<[1], [0], [0], [1], [0, 0, 1, 1], [], []>} : vector<8x8xf32>, vector<8x256xf32>, vector<8x256xf32> -> vector<8x256xf32>
    %c0_4 = arith.constant 0 : index
    %c0_5 = arith.constant 0 : index
    %4 = vector.load %arg2[%c0_4, %c0_5] : memref<256x256xf32, #tpu.memory_space<vmem>>, vector<256x256xf32>
    %cst_6 = arith.constant dense<0.000000e+00> : vector<8x256xf32>
    %5 = tpu.matmul %3, %4, %cst_6 {dimension_numbers = #tpu.dot_dimension_numbers<[1], [0], [0], [1], [0, 0, 1, 1], [], []>} : vector<8x256xf32>, vector<256x256xf32>, vector<8x256xf32> -> vector<8x256xf32>
    %c0_7 = arith.constant 0 : index
    %c0_8 = arith.constant 0 : index
    %c0_9 = arith.constant 0 : index
    %6 = vector.load %arg4[%c0_7, %c0_8, %c0_9] : memref<1x8x256xf32, #tpu.memory_space<vmem>>, vector<1x8x256xf32>
    %7 = vector.shape_cast %6 : vector<1x8x256xf32> to vector<8x256xf32>
    %8 = vector.shape_cast %5 : vector<8x256xf32> to vector<1x8x256xf32>
    tpu.vector_store %arg4[%c0_7, %c0_8, %c0_9], %8 {strides = array<i32>} : memref<1x8x256xf32, #tpu.memory_space<vmem>>, vector<1x8x256xf32>,
    return
  }
  func.func @transform_0(%arg0: i32) -> (i32, i32) {
    %c0_i32 = arith.constant 0 : i32
    %c0_i32_0 = arith.constant 0 : i32
    %c0_i32_1 = arith.constant 0 : i32
    return %c0_i32, %c0_i32_0 : i32, i32
  }
  func.func @transform_1(%arg0: i32) -> (i32, i32) {
    %c0_i32 = arith.constant 0 : i32
    %c0_i32_0 = arith.constant 0 : i32
    %c0_i32_1 = arith.constant 0 : i32
    return %c0_i32, %c0_i32_0 : i32, i32
  }
  func.func @transform_2(%arg0: i32) -> (i32, i32, i32) {
    %c0_i32 = arith.constant 0 : i32
    %c0_i32_0 = arith.constant 0 : i32
    %c0_i32_1 = arith.constant 0 : i32
    return %arg0, %c0_i32, %c0_i32_0 : i32, i32, i32
  }
  func.func @transform_3(%arg0: i32) -> (i32, i32, i32) {
    %c0_i32 = arith.constant 0 : i32
    %c0_i32_0 = arith.constant 0 : i32
    %c0_i32_1 = arith.constant 0 : i32
    return %arg0, %c0_i32, %c0_i32_0 : i32, i32, i32
  }
}

</mosaic_0001>

<bundles_post_ra>
// kernel: tpu_custom_call.1
= control target key start
LH: loop header
LB: loop body
LE: loop exit
PB: predicated region body
PF: predicated region fallthrough
CT: control target
= control target key end

     0   :  { %8 = vsyncpa [#allocation3], 0  ;;  %s983_s0 = inlined_call_operand.hbm [shape: f32[8,8], index: 0, kind: input, shape index: {}]   ;;  %s984_s1 = inlined_call_operand.hbm [shape: f32[256,256], index: 1, kind: input, shape index: {}]   ;;  %s985_s2 = inlined_call_operand.hbm [shape: f32[2,8,256], index: 2, kind: input, shape index: {}]   ;;  %s986_s3 = inlined_call_operand.hbm [shape: f32[2,8,256], index: 3, kind: output, shape index: {}]  }
   0x1   :  { %9 = vsyncpa [#allocation6], 0 }
   0x2   :  { %10 = vsyncpa [#allocation4], 0 }
   0x3   :  { %12 = vsyncpa [#allocation4 + $0x1], 0  ;;  %s803_s12 = smov 0   ;;  %s805_s13 = smov 0  }
   0x4   :  { %s807_s14 = smov 0   ;;  %s809_s15 = smov 0  }
   0x5 LB: > { %s824_s16 = sadd.s32 4294967295, %s774_s15   ;;  %s531_s17 = sadd.s32 4294967294, %s774_s15   ;;  %s774_s15 = sphi %s809_s15, %s1010_s15   ;;  %s770_s14 = sphi %s807_s14, %s1009_s14   ;;  %s766_s13 = sphi %s805_s13, %s1008_s13   ;;  %s762_s12 = sphi %s803_s12, %s1007_s12  }
   0x6   : > { %p80_p0 = scmp.ne.s32.totalorder %s766_s13, %s762_s12  ;;  %p987_p1 = scmp.eq.s32.totalorder %s824_s16, 0 }
   0x7   : > { %p110_p3 = scmp.eq.s32.totalorder %s531_s17, 1  ;;  %p532_p5 = scmp.ge.s32.totalorder %s774_s15, 1 }
   0x8   : > { %p833_p4 = por %p987_p1, %p80_p0  ;;  %p117_p7 = scmp.lt.s32.totalorder %s774_s15, 3 }
   0x9   : > { %p838_p6 = por %p110_p3, %p80_p0  ;;  %s776_s21 = smov [#allocation2]  }
   0xa   : > { %s991_s18 = scalar_select %p833_p4, 1, 0 }
   0xb   : > { %s992_s19 = scalar_select %p838_p6, 1, 0 }
   0xc   : > { %p843_p8 = pnand %p532_p5, %p117_p7  ;;  %s130_s22 = sshll.u32 %s776_s21, 4  ;;  %s131_s22 = int_to_ptr.vmem [resolvable:$true] %s130_s22 }
   0xd   : > { %s777_s23 = smov [#allocation5]   ;;  %s633_s26 = scalar_lea.vmem %s131_s22, 128 }
   0xe   : > { %s993_s20 = scalar_select %p843_p8, 1, 0 }
   0xf   : > { %p564_p10 = pneg %p843_p8  ;;  %s140_s24 = sshll.u32 %s777_s23, 4  ;;  %s141_s24 = int_to_ptr.vmem [resolvable:$true] %s140_s24 }
  0x10   : > { %p634_p13 = scmp.ne.s32.totalorder %s131_s22, %s633_s26  ;;  %p641_p5 = scmp.lt.s32.totalorder %s131_s22, %s131_s22 }
  0x11   : > { %p852_p11 = pnand %p564_p10, %p987_p1  ;;  %p642_p7 = scmp.lt.s32.totalorder %s633_s26, %s633_s26 }
  0x13   : > { %p624_p12 = pneg %p852_p11  ;;  %p643_p9 = por %p642_p7, %p641_p5 }
  0x15   : > { %p636_p0 = pnand %p634_p13, %p624_p12 }
  0x17   : > { %p637_p3 = pneg %p636_p0 }
  0x19   : > { %p644_p2 = pnand %p643_p9, %p637_p3 }
  0x1b   : > { %647 = shalt.err (!%p644_p2)
}
  0x1c   : > { %567 = dma.hbm_to_vmem [thread:$0]  (!%p852_p11), %s983_s0, 128, %s131_s22, [#allocation3]  }
  0x1d   : > { %s659_s29 = scalar_lea.vmem %s141_s24, 8192  ;;  %p667_p13 = scmp.lt.s32.totalorder %s141_s24, %s141_s24 }
  0x1e   : > { %p660_p10 = scmp.ne.s32.totalorder %s141_s24, %s659_s29  ;;  %p668_p0 = scmp.lt.s32.totalorder %s659_s29, %s659_s29 }
  0x20   : > { %p662_p1 = pnand %p660_p10, %p624_p12  ;;  %p669_p4 = por %p668_p0, %p667_p13 }
  0x22   : > { %p663_p6 = pneg %p662_p1 }
  0x24   : > { %p670_p8 = pnand %p669_p4, %p663_p6 }
  0x26   : > { %673 = shalt.err (!%p670_p8)
}
  0x27   : > { %s778_s30 = smov 256   ;;  %s779_s4 = smov 16  }
  0x28   : > { %570 = dma.hbm_to_vmem [thread:$0]  (!%p852_p11), %s984_s1, 8192, %s141_s24, [#allocation6], %s778_s30, %s778_s30, %s779_s4  }
  0x29   : > { %s875_s7 = sadd.s32 1, %s774_s15   ;;  %s67_s8 = sadd.s32 1, %s770_s14 }
  0x2a   : > { %s64_s9 = ssub.s32 %s774_s15, %s875_s7  ;;  %p74_p1 = scmp.ne.s32.totalorder %s770_s14, %s766_s13 }
  0x2b   : > { %p65_p2 = scmp.eq.s32.totalorder %s64_s9, 0  ;;  %p75_p4 = scmp.eq.s32.totalorder %s774_s15, 0 }
  0x2c   : > { %p995_p6 = scmp.eq.s32.totalorder %s824_s16, 1  ;;  %p581_p9 = scmp.lt.s32.totalorder %s774_s15, 2 }
  0x2d   : > { %s891_s11 = scalar_select %p65_p2, %s770_s14, %s67_s8  }
  0x2e   : > { %p885_p8 = por %p995_p6, %p74_p1  ;;  %p76_p12 = por %p75_p4, %p74_p1 }
  0x2f   : > { %s154_s17 = sand.u32 1, %s774_s15   ;;  %s156_s21 = sand.u32 1, %s770_s14  }
  0x30   : > { %s996_s10 = scalar_select %p885_p8, 1, 0 }
  0x31   : > { %s536_s22 = sshll.u32 %s156_s21, 4  ;;  %s550_s23 = sshll.u32 %s774_s15, 8 }
  0x32   : > { %s899_s26 = scalar_lea.hbm %s985_s2, %s550_s23  ;;  %s158_s27 = scalar_lea.vmem [#allocation7], %s536_s22 }
  0x33   : > { %s166_s28 = sshll.u32 %s158_s27, 4  ;;  %p901_p11 = pnand %p581_p9, %p76_p12  ;;  %s167_s28 = int_to_ptr.vmem [resolvable:$true] %s166_s28 }
  0x34   : > { %s155_s30 = scalar_lea.sflag [#allocation3], %s154_s17  ;;  %s674_s4 = scalar_lea.hbm %s899_s26, 256 }
  0x35   : > { %p675_p3 = scmp.ne.s32.totalorder %s899_s26, %s674_s4  ;;  %p676_p5 = pneg %p901_p11 }
  0x36   : > { %s679_s8 = scalar_lea.hbm %s985_s2, 512  ;;  %p680_p13 = scmp.lt.s32.totalorder %s899_s26, %s985_s2 }
  0x37   : > { %p677_p7 = pnand %p676_p5, %p675_p3  ;;  %p681_p0 = scmp.lt.s32.totalorder %s679_s8, %s674_s4 }
  0x39   : > { %p678_p10 = pneg %p677_p7  ;;  %p682_p1 = por %p681_p0, %p680_p13 }
  0x3b   : > { %p683_p2 = pnand %p682_p1, %p678_p10 }
  0x3d   : > { %686 = shalt.err (!%p683_p2)
}
  0x3e   : > { %s687_s22 = scalar_lea.vmem %s167_s28, 256  ;;  %s780_s17 = smov [#allocation7]  }
  0x3f   : > { %p688_p4 = scmp.ne.s32.totalorder %s167_s28, %s687_s22  ;;  %s692_s23 = sshll.u32 %s780_s17, 4  ;;  %s693_s23 = int_to_ptr.vmem [resolvable:$false] %s692_s23 }
  0x40   : > { %s694_s24 = scalar_lea.vmem %s693_s23, 512  ;;  %p695_p12 = scmp.lt.s32.totalorder %s167_s28, %s693_s23 }
  0x41   : > { %p690_p6 = pnand %p688_p4, %p676_p5  ;;  %p696_p3 = scmp.lt.s32.totalorder %s694_s24, %s687_s22 }
  0x43   : > { %p691_p9 = pneg %p690_p6  ;;  %p697_p7 = por %p696_p3, %p695_p12 }
  0x45   : > { %p698_p8 = pnand %p697_p7, %p691_p9 }
  0x47   : > { %701 = shalt.err (!%p698_p8)
}
  0x48   : > { %574 = dma.hbm_to_vmem [thread:$0]  (!%p901_p11), %s899_s26, 256, %s167_s28, %s155_s30  }
  0x49   : > { %p998_p10 = scmp.ne.s32.totalorder %s993_s20, 0 }
  0x4a   : > { %p999_p13 = scmp.eq.s32.totalorder (!%p998_p10), %s824_s16, 0 }
  0x4b   : > { %175 = sbr.rel (%p998_p10) target bundleno = 497 (0x1f1), region = 32 }
  0x50   : > { %745 = dma.done.wait (%p999_p13), [#allocation3], 128   ;;  %p1000_p5 = pmov %p999_p13 }
  0x52   : > { %747 = vsyncadd (%p1000_p5), [#allocation3], 4294967168  ;;  %p1001_p0 = pmov %p1000_p5 }
  0x54   : > { %749 = dma.done.wait (%p1001_p0), [#allocation6], 8192   ;;  %p1002_p1 = pmov %p1001_p0 }
  0x55   : > { %s185_s25 = sand.u32 1, %s824_s16   ;;  %s187_s26 = sand.u32 1, %s766_s13  }
  0x56   : > { %751 = vsyncadd (%p1002_p1), [#allocation6], 4294959104  ;;  %s933_s20 = sshll.u32 %s187_s26, 4  ;;  %s186_s27 = scalar_lea.sflag [#allocation3], %s185_s25 }
  0x57   : > { %s189_s28 = scalar_lea.vmem [#allocation7], %s933_s20  ;;  %p1003_p8 = scmp.ne.s32.totalorder %s991_s18, 0 }
  0x59   : > { %753 = dma.done.wait (%p1003_p8), %s186_s27, 256  }
  0x5a   : > { %755 = vsyncadd (%p1003_p8), %s186_s27, 4294967040  ;;  %v781_v0 = vmov 0.0   ;;  %v213_v1 = vld [vmem:[%s189_s28 + $0x8] sm:$0xff]  ;;  %v212_v2 = vld [vmem:[%s189_s28] sm:$0xff]  ;;  %vm215_vm0 = vcmask 64512   ;;  %s211_s18 = scalar_lea.vmem [#allocation8], %s933_s20 }
  0x5b   : > { %283 = vmatprep.mubr.f32.mxu0 %v781_v0  ;;  %v214_v3 = vld [vmem:[#allocation2] sm:$0xff]  ;;  %249 = vmatprep.subr.mxu0 %v213_v1  ;;  %v320_v5 = vld [vmem:[#allocation5 + $0xf0] sm:$0xff]  ;;  %v319_v6 = vld [vmem:[#allocation5 + $0xe8] sm:$0xff]  ;;  %s442_s29 = sshll.u32 %s211_s18, 4  ;;  %s551_s30 = sshll.u32 %s824_s16, 8  ;;  %s942_s29 = int_to_ptr.vmem [resolvable:$true] %s442_s29 }
  0x5c   : > { %v321_v4 = vld [vmem:[#allocation5 + $0xf8] sm:$0xff]  ;;  %250 = vmatpush1.msra.mxu0 %v212_v2  ;;  %v318_v7 = vld [vmem:[#allocation5 + $0xe0] sm:$0xff]  ;;  %v316_v9 = vld [vmem:[#allocation5 + $0xd0] sm:$0xff]  ;;  %s440_s6 = scalar_lea.hbm %s986_s3, %s551_s30  ;;  %s428_s8 = scalar_lea.sflag [#allocation4], %s187_s26 }
  0x5d   : > { %354 = vmatprep.subr.mxu1 %v321_v4  ;;  %544 = vmatmul.mubr.msk.f32.vlgmr.msra.gmra.mxu0 %vm215_vm0, %v214_v3  ;;  %v317_v8 = vld [vmem:[#allocation5 + $0xd8] sm:$0xff]  ;;  %v315_v10 = vld [vmem:[#allocation5 + $0xc8] sm:$0xff]  ;;  %v314_v11 = vld [vmem:[#allocation5 + $0xc0] sm:$0xff]  ;;  %s702_s9 = scalar_lea.vmem %s942_s29, 256  ;;  %p1004_p2 = scmp.ne.s32.totalorder %s996_s10, 0 }
  0x5e   : > { %355 = vmatpush1.msra.mxu1 %v320_v5  ;;  %v313_v12 = vld [vmem:[#allocation5 + $0xb8] sm:$0xff]  ;;  %v312_v13 = vld [vmem:[#allocation5 + $0xb0] sm:$0xff]  ;;  %v311_v14 = vld [vmem:[#allocation5 + $0xa8] sm:$0xff]  ;;  %p703_p11 = scmp.ne.s32.totalorder %s942_s29, %s702_s9  ;;  %s782_s16 = smov [#allocation8]  }
  0x5f   : > { %356 = vmatprep.subr.mxu1 %v319_v6  ;;  %v310_v15 = vld [vmem:[#allocation5 + $0xa0] sm:$0xff]  ;;  %v309_v16 = vld [vmem:[#allocation5 + $0x98] sm:$0xff]  ;;  %v308_v17 = vld [vmem:[#allocation5 + $0x90] sm:$0xff]  ;;  %s706_s21 = sshll.u32 %s782_s16, 4  ;;  %s707_s21 = int_to_ptr.vmem [resolvable:$false] %s706_s21 }
  0x60   : > { %357 = vmatpush1.msra.mxu1 %v318_v7  ;;  %v307_v18 = vld [vmem:[#allocation5 + $0x88] sm:$0xff]  ;;  %v306_v19 = vld [vmem:[#allocation5 + $0x80] sm:$0xff]  ;;  %v305_v20 = vld [vmem:[#allocation5 + $0x78] sm:$0xff]  ;;  %p704_p4 = pnand %p703_p11, %p1004_p2  ;;  %s708_s22 = scalar_lea.vmem %s707_s21, 512 }
  0x61   : > { %358 = vmatprep.subr.mxu1 %v317_v8  ;;  %v304_v21 = vld [vmem:[#allocation5 + $0x70] sm:$0xff]  ;;  %v303_v22 = vld [vmem:[#allocation5 + $0x68] sm:$0xff]  ;;  %v302_v23 = vld [vmem:[#allocation5 + $0x60] sm:$0xff]  ;;  %p709_p9 = scmp.lt.s32.totalorder %s942_s29, %s707_s21  ;;  %p710_p12 = scmp.lt.s32.totalorder %s708_s22, %s702_s9 }
  0x62   : > { %359 = vmatpush1.msra.mxu1 %v316_v9  ;;  %v301_v24 = vld [vmem:[#allocation5 + $0x58] sm:$0xff]  ;;  %v300_v25 = vld [vmem:[#allocation5 + $0x50] sm:$0xff]  ;;  %v299_v26 = vld [vmem:[#allocation5 + $0x48] sm:$0xff]  ;;  %p705_p6 = pneg %p704_p4 }
  0x63   : > { %360 = vmatprep.subr.mxu1 %v315_v10  ;;  %v298_v27 = vld [vmem:[#allocation5 + $0x40] sm:$0xff]  ;;  %v297_v28 = vld [vmem:[#allocation5 + $0x38] sm:$0xff]  ;;  %v296_v29 = vld [vmem:[#allocation5 + $0x30] sm:$0xff]  ;;  %p711_p3 = por %p710_p12, %p709_p9 }
  0x64   : > { %361 = vmatpush1.msra.mxu1 %v314_v11  ;;  %v295_v30 = vld [vmem:[#allocation5 + $0x28] sm:$0xff]  ;;  %v294_v31 = vld [vmem:[#allocation5 + $0x20] sm:$0xff]  ;;  %v293_v32 = vld [vmem:[#allocation5 + $0x18] sm:$0xff] }
  0x65   : > { %362 = vmatprep.subr.mxu1 %v313_v12  ;;  %v292_v33 = vld [vmem:[#allocation5 + $0x10] sm:$0xff]  ;;  %v291_v34 = vld [vmem:[#allocation5 + $0x8] sm:$0xff]  ;;  %v290_v35 = vld [vmem:[#allocation5] sm:$0xff]  ;;  %p712_p7 = pnand %p711_p3, %p705_p6 }
  0x66   : > { %363 = vmatpush1.msra.mxu1 %v312_v13  ;;  %v353_v36 = vld [vmem:[#allocation5 + $0x1f8] sm:$0xff]  ;;  %v352_v37 = vld [vmem:[#allocation5 + $0x1f0] sm:$0xff]  ;;  %v351_v38 = vld [vmem:[#allocation5 + $0x1e8] sm:$0xff] }
  0x67   : > { %364 = vmatprep.subr.mxu1 %v311_v14  ;;  %v350_v39 = vld [vmem:[#allocation5 + $0x1e0] sm:$0xff]  ;;  %v349_v40 = vld [vmem:[#allocation5 + $0x1d8] sm:$0xff]  ;;  %v348_v41 = vld [vmem:[#allocation5 + $0x1d0] sm:$0xff] }
  0x68   : > { %365 = vmatpush1.msra.mxu1 %v310_v15  ;;  %v347_v42 = vld [vmem:[#allocation5 + $0x1c8] sm:$0xff]  ;;  %v346_v43 = vld [vmem:[#allocation5 + $0x1c0] sm:$0xff]  ;;  %v345_v44 = vld [vmem:[#allocation5 + $0x1b8] sm:$0xff] }
  0x69   : > { %366 = vmatprep.subr.mxu1 %v309_v16  ;;  %v344_v45 = vld [vmem:[#allocation5 + $0x1b0] sm:$0xff]  ;;  %v343_v46 = vld [vmem:[#allocation5 + $0x1a8] sm:$0xff]  ;;  %v342_v47 = vld [vmem:[#allocation5 + $0x1a0] sm:$0xff] }
  0x6a   : > { %367 = vmatpush1.msra.mxu1 %v308_v17  ;;  %v341_v48 = vld [vmem:[#allocation5 + $0x198] sm:$0xff]  ;;  %v340_v49 = vld [vmem:[#allocation5 + $0x190] sm:$0xff]  ;;  %v339_v50 = vld [vmem:[#allocation5 + $0x188] sm:$0xff] }
  0x6b   : > { %368 = vmatprep.subr.mxu1 %v307_v18  ;;  %v338_v51 = vld [vmem:[#allocation5 + $0x180] sm:$0xff]  ;;  %v337_v52 = vld [vmem:[#allocation5 + $0x178] sm:$0xff]  ;;  %v336_v53 = vld [vmem:[#allocation5 + $0x170] sm:$0xff] }
  0x6c   : > { %369 = vmatpush1.msra.mxu1 %v306_v19  ;;  %v335_v54 = vld [vmem:[#allocation5 + $0x168] sm:$0xff]  ;;  %v334_v55 = vld [vmem:[#allocation5 + $0x160] sm:$0xff]  ;;  %v333_v56 = vld [vmem:[#allocation5 + $0x158] sm:$0xff] }
  0x6d   : > { %370 = vmatprep.subr.mxu1 %v305_v20  ;;  %v332_v57 = vld [vmem:[#allocation5 + $0x150] sm:$0xff]  ;;  %v331_v58 = vld [vmem:[#allocation5 + $0x148] sm:$0xff]  ;;  %v330_v59 = vld [vmem:[#allocation5 + $0x140] sm:$0xff] }
  0x6e   : > { %371 = vmatpush1.msra.mxu1 %v304_v21  ;;  %v329_v60 = vld [vmem:[#allocation5 + $0x138] sm:$0xff]  ;;  %v328_v61 = vld [vmem:[#allocation5 + $0x130] sm:$0xff]  ;;  %v327_v62 = vld [vmem:[#allocation5 + $0x128] sm:$0xff] }
  0x6f   : > { %372 = vmatprep.subr.mxu1 %v303_v22  ;;  %v326_v63 = vld [vmem:[#allocation5 + $0x120] sm:$0xff]  ;;  %v325_v0 = vld [vmem:[#allocation5 + $0x118] sm:$0xff]  ;;  %v324_v1 = vld [vmem:[#allocation5 + $0x110] sm:$0xff] }
  0x70   : > { %373 = vmatpush1.msra.mxu1 %v302_v23  ;;  %v323_v2 = vld [vmem:[#allocation5 + $0x108] sm:$0xff]  ;;  %v322_v3 = vld [vmem:[#allocation5 + $0x100] sm:$0xff] }
  0x71   : > { %374 = vmatprep.subr.mxu1 %v301_v24 }
  0x72   : > { %375 = vmatpush1.msra.mxu1 %v300_v25 }
  0x73   : > { %376 = vmatprep.subr.mxu1 %v299_v26 }
  0x74   : > { %377 = vmatpush1.msra.mxu1 %v298_v27 }
  0x75   : > { %378 = vmatprep.subr.mxu1 %v297_v28 }
  0x76   : > { %379 = vmatpush1.msra.mxu1 %v296_v29 }
  0x77   : > { %380 = vmatprep.subr.mxu1 %v295_v30 }
  0x78   : > { %381 = vmatpush1.msra.mxu1 %v294_v31 }
  0x79   : > { %382 = vmatprep.subr.mxu1 %v293_v32 }
  0x7a   : > { %383 = vmatpush1.msra.mxu1 %v292_v33 }
  0x7b   : > { %384 = vmatprep.subr.mxu1 %v291_v34 }
  0x7c   : > { %385 = vmatpush1.msra.mxu1 %v290_v35 }
  0x7d   : > { %386 = vmatprep.subr.mxu1 %v353_v36 }
  0x7e   : > { %387 = vmatpush2.msra.mxu1 %v352_v37 }
  0x7f   : > { %388 = vmatprep.subr.mxu1 %v351_v38 }
  0x80   : > { %389 = vmatpush2.msra.mxu1 %v350_v39 }
  0x81   : > { %390 = vmatprep.subr.mxu1 %v349_v40 }
  0x82   : > { %391 = vmatpush2.msra.mxu1 %v348_v41 }
  0x83   : > { %392 = vmatprep.subr.mxu1 %v347_v42 }
  0x84   : > { %393 = vmatpush2.msra.mxu1 %v346_v43 }
  0x85   : > { %394 = vmatprep.subr.mxu1 %v345_v44 }
  0x86   : > { %395 = vmatpush2.msra.mxu1 %v344_v45 }
  0x87   : > { %396 = vmatprep.subr.mxu1 %v343_v46 }
  0x88   : > { %397 = vmatpush2.msra.mxu1 %v342_v47 }
  0x89   : > { %398 = vmatprep.subr.mxu1 %v341_v48 }
  0x8a   : > { %399 = vmatpush2.msra.mxu1 %v340_v49 }
  0x8b   : > { %400 = vmatprep.subr.mxu1 %v339_v50 }
  0x8c   : > { %401 = vmatpush2.msra.mxu1 %v338_v51 }
  0x8d   : > { %402 = vmatprep.subr.mxu1 %v337_v52 }
  0x8e   : > { %403 = vmatpush2.msra.mxu1 %v336_v53 }
  0x8f   : > { %404 = vmatprep.subr.mxu1 %v335_v54 }
  0x90   : > { %405 = vmatpush2.msra.mxu1 %v334_v55 }
  0x91   : > { %406 = vmatprep.subr.mxu1 %v333_v56 }
  0x92   : > { %407 = vmatpush2.msra.mxu1 %v332_v57 }
  0x93   : > { %408 = vmatprep.subr.mxu1 %v331_v58 }
  0x94   : > { %409 = vmatpush2.msra.mxu1 %v330_v59 }
  0x95   : > { %410 = vmatprep.subr.mxu1 %v329_v60 }
  0x96   : > { %411 = vmatpush2.msra.mxu1 %v328_v61 }
  0x97   : > { %412 = vmatprep.subr.mxu1 %v327_v62 }
  0x98   : > { %413 = vmatpush2.msra.mxu1 %v326_v63 }
  0x99   : > { %414 = vmatprep.subr.mxu1 %v325_v0 }
  0x9a   : > { %415 = vmatpush2.msra.mxu1 %v324_v1 }
  0x9b   : > { %416 = vmatprep.subr.mxu1 %v323_v2 }
  0x9c   : > { %417 = vmatpush2.msra.mxu1 %v322_v3 }
 0x11d   : > { %v285_v4 = vpop.f32.mrf.mxu0 }
 0x11f   : > { %v287_v5 = vpop.f32.mrf.mxu0 }
 0x120   : > { %418 = vmatprep.mubr.f32.mxu1 %v287_v5 }
 0x121   : > { %419 = vmatmul.mubr.f32.vlgmr.msra.gmra.mxu1 %v285_v4 }
 0x1e1   : > { %v420_v6 = vpop.f32.mrf.mxu1 }
 0x1e2   : > { %425 = vst [vmem:[%s211_s18] sm:$0xff] %v420_v6 }
 0x1e3   : > { %v422_v7 = vpop.f32.mrf.mxu1 }
 0x1e4   : > { %426 = vst [vmem:[%s211_s18 + $0x8] sm:$0xff] %v422_v7 }
 0x1e5   : > { %715 = shalt.err (!%p712_p7)
}
 0x1e6   : > { %s716_s17 = scalar_lea.hbm %s440_s6, 256  ;;  %s720_s25 = scalar_lea.hbm %s986_s3, 512 }
 0x1e7   : > { %p717_p10 = scmp.ne.s32.totalorder %s440_s6, %s716_s17  ;;  %p721_p0 = scmp.lt.s32.totalorder %s440_s6, %s986_s3 }
 0x1e8   : > { %p722_p1 = scmp.lt.s32.totalorder %s720_s25, %s716_s17 }
 0x1e9   : > { %p718_p13 = pnand %p717_p10, %p1004_p2 }
 0x1ea   : > { %p723_p8 = por %p722_p1, %p721_p0 }
 0x1eb   : > { %p719_p5 = pneg %p718_p13 }
 0x1ed   : > { %p724_p11 = pnand %p723_p8, %p719_p5 }
 0x1ef   : > { %727 = shalt.err (!%p724_p11)
}
 0x1f0   : > { %562 = dma.vmem_to_hbm [thread:$0]  (%p1004_p2), %s942_s29, 256, %s440_s6, %s428_s8  }
 0x1f1 PF: > { %s454_s27 = sand.u32 1, %s762_s12   ;;  %p1005_p4 = scmp.ne.s32.totalorder %s992_s19, 0 }
 0x1f2   : > { %p1006_p6 = scmp.ge.s32.totalorder %s774_s15, 2  ;;  %s455_s28 = scalar_lea.sflag [#allocation4], %s454_s27 }
 0x1f4   : > { %p576_p9 = pnand %p1006_p6, %p1005_p4 }
 0x1f6   : > { %p577_p12 = pneg %p576_p9 }
 0x1f8   : > { %757 = dma.done.wait (%p577_p12), %s455_s28, 256  }
 0x1f9   : > { %759 = vsyncadd (%p577_p12), %s455_s28, 4294967040  ;;  %p15_p3 = scmp.ge.s32.totalorder %s875_s7, 4   ;;  %s1007_s12 = smov %s766_s13 }
 0x1fa   : > { %s1008_s13 = smov %s770_s14  ;;  %s1009_s14 = smov %s891_s11 }
 0x1fb   : > { %s1010_s15 = smov %s875_s7  ;;  %17 = sbr.rel (!%p15_p3) target bundleno = 5 (0x5), region = 84 }
 0x200   :  { %460 = vsyncpa [#allocation3], 1 }
 0x201   :  { %462 = vsyncpa [#allocation3 + $0x1], 1 }
 0x202   :  { %463 = vsyncpa [#allocation6], 1 }
 0x203   :  { %464 = vsyncpa [#allocation4], 1 }
 0x204   :  { %466 = vsyncpa [#allocation4 + $0x1], 1 }

</bundles_post_ra>
